<compile_context>
chip_gen: v5e
topology: v5e:2x2
jax: 0.10.0
libtpu: 0.0.40
codegen_flags: <defaults>
</compile_context>

<pallas_src>
import jax
import jax.numpy as jnp
from jax.experimental import pallas as pl
from jax.experimental.pallas import tpu as pltpu

_LANE = 128
_SUBLANE = 8


def _round_up(n, m):
    return ((n + m - 1) // m) * m


def _pad2d(a, rows, cols):
    return jnp.pad(a, ((0, rows - a.shape[0]), (0, cols - a.shape[1])))


def _make_kernel(n_layers, num_fc, out_valid):
    """Fused: BN-fold -> [BinActive -> BinLinear (-> A_hat agg)]* -> log_softmax."""

    def kernel(x_ref, rm_ref, a_ref, w_ref, alpha_ref, bias_ref, o_ref):
        x = x_ref[...]          # [Npad, D] f32 node features (zero padded)
        rm = rm_ref[...]        # [1, D]    f32 BN running mean (zero padded)
        a_hat = a_ref[...]      # [Npad, Npad] f32 normalized adjacency

        for li in range(n_layers):
            wb = w_ref[li]          # [D, D] bf16 sign(W), zero padded
            alpha = alpha_ref[li]   # [1, D] f32 per-output-column scale
            bias = bias_ref[li]     # [1, D] f32

            # BinActive (>= 0 -> +1, < 0 -> -1).  The BN scale rsqrt(var+eps)
            # is positive, so for the first layer sign((x-rm)*scale) == (x>=rm).
            # ±1 is exact in bf16.
            if li == 0:
                xb = jnp.where(x >= rm, 1.0, -1.0).astype(jnp.bfloat16)
            else:
                xb = jnp.where(x >= 0.0, 1.0, -1.0).astype(jnp.bfloat16)

            # Binary matmul on the bf16 MXU path; result is exact small ints.
            # dropout before each conv layer: identity (eval mode).
            h = jnp.dot(xb, wb, preferred_element_type=jnp.float32)
            if li >= num_fc:
                # BiGCNConv propagation with the normalized adjacency (f32).
                h = jnp.dot(a_hat, h, preferred_element_type=jnp.float32)
            # x @ (sign(W) * alpha) + b  ==  (x @ sign(W)) * alpha + b
            x = h * alpha + bias

        # log_softmax over dim=1, restricted to the valid (unpadded) columns.
        col = jax.lax.broadcasted_iota(jnp.int32, x.shape, 1)
        xm = jnp.where(col < out_valid, x, -1e30)
        m = jnp.max(xm, axis=1, keepdims=True)
        s = xm - m
        lse = jnp.log(jnp.sum(jnp.exp(s), axis=1, keepdims=True))
        o_ref[...] = (s - lse).astype(o_ref.dtype)

    return kernel


def bigcn_mlp_forward(x, a_hat, params, num_convs):
    """Host wrapper: pre-binarize + stack weights, pad to MXU shapes, call Pallas."""
    n, c = x.shape
    layer_ws = [params["w1"], params["w2"]] + list(params["conv_w"])
    layer_bs = [params["b1"], params["b2"]] + list(params["conv_b"])
    n_layers = len(layer_ws)
    out_dim = layer_ws[-1].shape[1]

    n_pad = _round_up(n, _SUBLANE)
    d_pad = _round_up(
        max([c] + [w.shape[0] for w in layer_ws] + [w.shape[1] for w in layer_ws]),
        _LANE)

    # Host-side (input-invariant) Bi-GCN weight binarization, stacked so the
    # kernel takes 3 weight tensors total instead of 3 per layer.
    w_stack = jnp.stack(
        [_pad2d(jnp.sign(w).astype(jnp.bfloat16), d_pad, d_pad) for w in layer_ws])
    alpha_stack = jnp.stack(
        [_pad2d(jnp.mean(jnp.abs(w), axis=0, keepdims=True).astype(jnp.float32),
                1, d_pad) for w in layer_ws])
    bias_stack = jnp.stack(
        [_pad2d(b.astype(jnp.float32), 1, d_pad) for b in layer_bs])

    inputs = [
        _pad2d(x.astype(jnp.float32), n_pad, d_pad),
        _pad2d(params["rm"].astype(jnp.float32), 1, d_pad),
        _pad2d(a_hat.astype(jnp.float32), n_pad, n_pad),
        w_stack,
        alpha_stack,
        bias_stack,
    ]
    vmem_spec = pl.BlockSpec(memory_space=pltpu.MemorySpace.VMEM)
    out_padded = pl.pallas_call(
        _make_kernel(n_layers, 2, out_dim),
        out_shape=jax.ShapeDtypeStruct((n_pad, d_pad), jnp.float32),
        in_specs=[vmem_spec] * len(inputs),
        out_specs=vmem_spec,
    )(*inputs)
    return out_padded[:n, :out_dim]


def build_normalized_adjacency(edge_index, num_nodes):
    """Dense A_hat = D^-1/2 (A + I) D^-1/2 (PyG GCN normalization)."""
    src, dst = edge_index[0], edge_index[1]
    a = jnp.zeros((num_nodes, num_nodes), jnp.float32)
    a = a.at[dst, src].set(1.0)                      # message j -> i
    a = a + jnp.eye(num_nodes, dtype=jnp.float32)    # self loops
    deg = jnp.sum(a, axis=1)
    dinv = jax.lax.rsqrt(jnp.maximum(deg, 1e-12))
    return dinv[:, None] * a * dinv[None, :]


def _reference_jnp(x, a_hat, params, num_convs):
    """Plain-JAX reference (algebraically identical factored alpha form)."""
    eps = 1e-5

    def binact(v):
        return jnp.where(v >= 0, 1.0, -1.0)

    def binlinear(v, w, b):
        alpha = jnp.mean(jnp.abs(w), axis=0, keepdims=True)
        return jnp.dot(v, jnp.sign(w),
                       preferred_element_type=jnp.float32) * alpha + b

    h = (x - params["rm"]) * jax.lax.rsqrt(params["rv"] + eps)  # BatchNorm1d eval
    h = binact(h)
    h = binlinear(h, params["w1"], params["b1"])
    h = binact(h)
    h = binlinear(h, params["w2"], params["b2"])
    for li in range(num_convs):
        w, b = params["conv_w"][li], params["conv_b"][li]
        alpha = jnp.mean(jnp.abs(w), axis=0, keepdims=True)
        h = binact(h)  # dropout: identity (eval)
        h = jnp.dot(a_hat,
                    jnp.dot(h, jnp.sign(w), preferred_element_type=jnp.float32),
                    preferred_element_type=jnp.float32) * alpha + b
    return jax.nn.log_softmax(h, axis=1)


if __name__ == "__main__":
    # Model hyper-params (small, consistent with the module's __init__).
    in_channels, hidden_channels, out_channels = 32, 32, 7
    layers = 2
    num_nodes = 16

    key = jax.random.PRNGKey(0)
    keys = jax.random.split(key, 10)

    # Node features [N, C] and a deterministic ring graph (both directions).
    x = jax.random.normal(keys[0], (num_nodes, in_channels), jnp.float32)
    idx = jnp.arange(num_nodes)
    src = jnp.concatenate([idx, (idx + 1) % num_nodes])
    dst = jnp.concatenate([(idx + 1) % num_nodes, idx])
    edge_index = jnp.stack([src, dst], axis=0)
    a_hat = build_normalized_adjacency(edge_index, num_nodes)

    half = in_channels // 2
    conv_dims = []
    for i in range(layers):
        d_in = hidden_channels if i > 0 else 10
        d_out = hidden_channels if i < layers - 1 else out_channels
        conv_dims.append((d_in, d_out))

    params = {
        # BatchNorm1d(affine=False) running stats.
        "rm": jax.random.normal(keys[1], (1, in_channels), jnp.float32) * 0.1,
        "rv": jax.random.uniform(keys[2], (1, in_channels), jnp.float32,
                                 minval=0.5, maxval=1.5),
        # BinFC weights stored as [in, out] for direct x @ W.
        "w1": jax.random.normal(keys[3], (in_channels, half), jnp.float32) * 0.1,
        "b1": jax.random.normal(keys[4], (1, half), jnp.float32) * 0.1,
        "w2": jax.random.normal(keys[5], (half, 10), jnp.float32) * 0.1,
        "b2": jax.random.normal(keys[6], (1, 10), jnp.float32) * 0.1,
        "conv_w": [
            jax.random.normal(keys[7], conv_dims[0], jnp.float32) * 0.1,
            jax.random.normal(keys[8], conv_dims[1], jnp.float32) * 0.1,
        ],
        "conv_b": [
            jax.random.normal(keys[9], (1, conv_dims[0][1]), jnp.float32) * 0.1,
            jax.random.normal(keys[2], (1, conv_dims[1][1]), jnp.float32) * 0.1,
        ],
    }

    out = bigcn_mlp_forward(x, a_hat, params, layers)
    out = jax.block_until_ready(out)

    ref = _reference_jnp(x, a_hat, params, layers)
    assert out.shape == (num_nodes, out_channels)
    assert jnp.allclose(out, ref, atol=1e-4, rtol=1e-4), "mismatch vs jnp reference"

    print("KERNEL_OK")
</pallas_src>

<mosaic_0001>
module attributes {stable_mosaic.version = 11 : i64} {
  func.func @kernel(%arg0: memref<16x128xf32, #tpu.memory_space<vmem>>, %arg1: memref<1x128xf32, #tpu.memory_space<vmem>>, %arg2: memref<16x16xf32, #tpu.memory_space<vmem>>, %arg3: memref<4x128x128xbf16, #tpu.memory_space<vmem>>, %arg4: memref<4x1x128xf32, #tpu.memory_space<vmem>>, %arg5: memref<4x1x128xf32, #tpu.memory_space<vmem>>, %arg6: memref<16x128xf32, #tpu.memory_space<vmem>>) attributes {dimension_semantics = [], scalar_prefetch = 0 : i64, scratch_operands = 0 : i64, tpu.core_type = #tpu.core_type<tc>} {
    %c0 = arith.constant 0 : index
    %c0_0 = arith.constant 0 : index
    %0 = vector.load %arg0[%c0, %c0_0] : memref<16x128xf32, #tpu.memory_space<vmem>>, vector<16x128xf32>
    %c0_1 = arith.constant 0 : index
    %c0_2 = arith.constant 0 : index
    %1 = vector.load %arg1[%c0_1, %c0_2] : memref<1x128xf32, #tpu.memory_space<vmem>>, vector<1x128xf32>
    %c0_3 = arith.constant 0 : index
    %c0_4 = arith.constant 0 : index
    %2 = vector.load %arg2[%c0_3, %c0_4] : memref<16x16xf32, #tpu.memory_space<vmem>>, vector<16x16xf32>
    %c0_5 = arith.constant 0 : index
    %c0_6 = arith.constant 0 : index
    %c0_7 = arith.constant 0 : index
    %3 = vector.load %arg3[%c0_5, %c0_6, %c0_7] : memref<4x128x128xbf16, #tpu.memory_space<vmem>>, vector<1x128x128xbf16>
    %4 = vector.shape_cast %3 : vector<1x128x128xbf16> to vector<128x128xbf16>
    %c0_8 = arith.constant 0 : index
    %c0_9 = arith.constant 0 : index
    %c0_10 = arith.constant 0 : index
    %5 = vector.load %arg4[%c0_8, %c0_9, %c0_10] : memref<4x1x128xf32, #tpu.memory_space<vmem>>, vector<1x1x128xf32>
    %6 = vector.shape_cast %5 : vector<1x1x128xf32> to vector<1x128xf32>
    %c0_11 = arith.constant 0 : index
    %c0_12 = arith.constant 0 : index
    %c0_13 = arith.constant 0 : index
    %7 = vector.load %arg5[%c0_11, %c0_12, %c0_13] : memref<4x1x128xf32, #tpu.memory_space<vmem>>, vector<1x1x128xf32>
    %8 = vector.shape_cast %7 : vector<1x1x128xf32> to vector<1x128xf32>
    %9 = vector.broadcast %1 : vector<1x128xf32> to vector<16x128xf32>
    %10 = arith.cmpf oge, %0, %9 : vector<16x128xf32>
    %cst = arith.constant 1.000000e+00 : f32
    %cst_14 = arith.constant -1.000000e+00 : f32
    %11 = vector.broadcast %cst : f32 to vector<16x128xf32>
    %12 = vector.broadcast %cst_14 : f32 to vector<16x128xf32>
    %13 = arith.select %10, %11, %12 : vector<16x128xi1>, vector<16x128xf32>
    %14 = arith.truncf %13 : vector<16x128xf32> to vector<16x128xbf16>
    %cst_15 = arith.constant dense<0.000000e+00> : vector<16x128xf32>
    %15 = tpu.matmul %14, %4, %cst_15 {dimension_numbers = #tpu.dot_dimension_numbers<[1], [0], [0], [1], [0, 0, 1, 1], [], []>} : vector<16x128xbf16>, vector<128x128xbf16>, vector<16x128xf32> -> vector<16x128xf32>
    %16 = vector.broadcast %6 : vector<1x128xf32> to vector<16x128xf32>
    %17 = arith.mulf %15, %16 : vector<16x128xf32>
    %18 = vector.broadcast %8 : vector<1x128xf32> to vector<16x128xf32>
    %19 = arith.addf %17, %18 : vector<16x128xf32>
    %c1 = arith.constant 1 : index
    %c0_16 = arith.constant 0 : index
    %c0_17 = arith.constant 0 : index
    %20 = vector.load %arg3[%c1, %c0_16, %c0_17] : memref<4x128x128xbf16, #tpu.memory_space<vmem>>, vector<1x128x128xbf16>
    %21 = vector.shape_cast %20 : vector<1x128x128xbf16> to vector<128x128xbf16>
    %c1_18 = arith.constant 1 : index
    %c0_19 = arith.constant 0 : index
    %c0_20 = arith.constant 0 : index
    %22 = vector.load %arg4[%c1_18, %c0_19, %c0_20] : memref<4x1x128xf32, #tpu.memory_space<vmem>>, vector<1x1x128xf32>
    %23 = vector.shape_cast %22 : vector<1x1x128xf32> to vector<1x128xf32>
    %c1_21 = arith.constant 1 : index
    %c0_22 = arith.constant 0 : index
    %c0_23 = arith.constant 0 : index
    %24 = vector.load %arg5[%c1_21, %c0_22, %c0_23] : memref<4x1x128xf32, #tpu.memory_space<vmem>>, vector<1x1x128xf32>
    %25 = vector.shape_cast %24 : vector<1x1x128xf32> to vector<1x128xf32>
    %cst_24 = arith.constant 0.000000e+00 : f32
    %26 = vector.broadcast %cst_24 : f32 to vector<16x128xf32>
    %27 = arith.cmpf oge, %19, %26 : vector<16x128xf32>
    %cst_25 = arith.constant 1.000000e+00 : f32
    %cst_26 = arith.constant -1.000000e+00 : f32
    %28 = vector.broadcast %cst_25 : f32 to vector<16x128xf32>
    %29 = vector.broadcast %cst_26 : f32 to vector<16x128xf32>
    %30 = arith.select %27, %28, %29 : vector<16x128xi1>, vector<16x128xf32>
    %31 = arith.truncf %30 : vector<16x128xf32> to vector<16x128xbf16>
    %cst_27 = arith.constant dense<0.000000e+00> : vector<16x128xf32>
    %32 = tpu.matmul %31, %21, %cst_27 {dimension_numbers = #tpu.dot_dimension_numbers<[1], [0], [0], [1], [0, 0, 1, 1], [], []>} : vector<16x128xbf16>, vector<128x128xbf16>, vector<16x128xf32> -> vector<16x128xf32>
    %33 = vector.broadcast %23 : vector<1x128xf32> to vector<16x128xf32>
    %34 = arith.mulf %32, %33 : vector<16x128xf32>
    %35 = vector.broadcast %25 : vector<1x128xf32> to vector<16x128xf32>
    %36 = arith.addf %34, %35 : vector<16x128xf32>
    %c2 = arith.constant 2 : index
    %c0_28 = arith.constant 0 : index
    %c0_29 = arith.constant 0 : index
    %37 = vector.load %arg3[%c2, %c0_28, %c0_29] : memref<4x128x128xbf16, #tpu.memory_space<vmem>>, vector<1x128x128xbf16>
    %38 = vector.shape_cast %37 : vector<1x128x128xbf16> to vector<128x128xbf16>
    %c2_30 = arith.constant 2 : index
    %c0_31 = arith.constant 0 : index
    %c0_32 = arith.constant 0 : index
    %39 = vector.load %arg4[%c2_30, %c0_31, %c0_32] : memref<4x1x128xf32, #tpu.memory_space<vmem>>, vector<1x1x128xf32>
    %40 = vector.shape_cast %39 : vector<1x1x128xf32> to vector<1x128xf32>
    %c2_33 = arith.constant 2 : index
    %c0_34 = arith.constant 0 : index
    %c0_35 = arith.constant 0 : index
    %41 = vector.load %arg5[%c2_33, %c0_34, %c0_35] : memref<4x1x128xf32, #tpu.memory_space<vmem>>, vector<1x1x128xf32>
    %42 = vector.shape_cast %41 : vector<1x1x128xf32> to vector<1x128xf32>
    %cst_36 = arith.constant 0.000000e+00 : f32
    %43 = vector.broadcast %cst_36 : f32 to vector<16x128xf32>
    %44 = arith.cmpf oge, %36, %43 : vector<16x128xf32>
    %cst_37 = arith.constant 1.000000e+00 : f32
    %cst_38 = arith.constant -1.000000e+00 : f32
    %45 = vector.broadcast %cst_37 : f32 to vector<16x128xf32>
    %46 = vector.broadcast %cst_38 : f32 to vector<16x128xf32>
    %47 = arith.select %44, %45, %46 : vector<16x128xi1>, vector<16x128xf32>
    %48 = arith.truncf %47 : vector<16x128xf32> to vector<16x128xbf16>
    %cst_39 = arith.constant dense<0.000000e+00> : vector<16x128xf32>
    %49 = tpu.matmul %48, %38, %cst_39 {dimension_numbers = #tpu.dot_dimension_numbers<[1], [0], [0], [1], [0, 0, 1, 1], [], []>} : vector<16x128xbf16>, vector<128x128xbf16>, vector<16x128xf32> -> vector<16x128xf32>
    %cst_40 = arith.constant dense<0.000000e+00> : vector<16x128xf32>
    %50 = tpu.matmul %2, %49, %cst_40 {dimension_numbers = #tpu.dot_dimension_numbers<[1], [0], [0], [1], [0, 0, 1, 1], [], []>} : vector<16x16xf32>, vector<16x128xf32>, vector<16x128xf32> -> vector<16x128xf32>
    %51 = vector.broadcast %40 : vector<1x128xf32> to vector<16x128xf32>
    %52 = arith.mulf %50, %51 : vector<16x128xf32>
    %53 = vector.broadcast %42 : vector<1x128xf32> to vector<16x128xf32>
    %54 = arith.addf %52, %53 : vector<16x128xf32>
    %c3 = arith.constant 3 : index
    %c0_41 = arith.constant 0 : index
    %c0_42 = arith.constant 0 : index
    %55 = vector.load %arg3[%c3, %c0_41, %c0_42] : memref<4x128x128xbf16, #tpu.memory_space<vmem>>, vector<1x128x128xbf16>
    %56 = vector.shape_cast %55 : vector<1x128x128xbf16> to vector<128x128xbf16>
    %c3_43 = arith.constant 3 : index
    %c0_44 = arith.constant 0 : index
    %c0_45 = arith.constant 0 : index
    %57 = vector.load %arg4[%c3_43, %c0_44, %c0_45] : memref<4x1x128xf32, #tpu.memory_space<vmem>>, vector<1x1x128xf32>
    %58 = vector.shape_cast %57 : vector<1x1x128xf32> to vector<1x128xf32>
    %c3_46 = arith.constant 3 : index
    %c0_47 = arith.constant 0 : index
    %c0_48 = arith.constant 0 : index
    %59 = vector.load %arg5[%c3_46, %c0_47, %c0_48] : memref<4x1x128xf32, #tpu.memory_space<vmem>>, vector<1x1x128xf32>
    %60 = vector.shape_cast %59 : vector<1x1x128xf32> to vector<1x128xf32>
    %cst_49 = arith.constant 0.000000e+00 : f32
    %61 = vector.broadcast %cst_49 : f32 to vector<16x128xf32>
    %62 = arith.cmpf oge, %54, %61 : vector<16x128xf32>
    %cst_50 = arith.constant 1.000000e+00 : f32
    %cst_51 = arith.constant -1.000000e+00 : f32
    %63 = vector.broadcast %cst_50 : f32 to vector<16x128xf32>
    %64 = vector.broadcast %cst_51 : f32 to vector<16x128xf32>
    %65 = arith.select %62, %63, %64 : vector<16x128xi1>, vector<16x128xf32>
    %66 = arith.truncf %65 : vector<16x128xf32> to vector<16x128xbf16>
    %cst_52 = arith.constant dense<0.000000e+00> : vector<16x128xf32>
    %67 = tpu.matmul %66, %56, %cst_52 {dimension_numbers = #tpu.dot_dimension_numbers<[1], [0], [0], [1], [0, 0, 1, 1], [], []>} : vector<16x128xbf16>, vector<128x128xbf16>, vector<16x128xf32> -> vector<16x128xf32>
    %cst_53 = arith.constant dense<0.000000e+00> : vector<16x128xf32>
    %68 = tpu.matmul %2, %67, %cst_53 {dimension_numbers = #tpu.dot_dimension_numbers<[1], [0], [0], [1], [0, 0, 1, 1], [], []>} : vector<16x16xf32>, vector<16x128xf32>, vector<16x128xf32> -> vector<16x128xf32>
    %69 = vector.broadcast %58 : vector<1x128xf32> to vector<16x128xf32>
    %70 = arith.mulf %68, %69 : vector<16x128xf32>
    %71 = vector.broadcast %60 : vector<1x128xf32> to vector<16x128xf32>
    %72 = arith.addf %70, %71 : vector<16x128xf32>
    %73 = tpu.iota {dimensions = array<i32: 1>} : vector<16x128xi32>
    %c7_i32 = arith.constant 7 : i32
    %74 = vector.broadcast %c7_i32 : i32 to vector<16x128xi32>
    %75 = arith.cmpi slt, %73, %74 : vector<16x128xi32>
    %cst_54 = arith.constant -1.000000e+30 : f32
    %76 = vector.broadcast %cst_54 : f32 to vector<16x128xf32>
    %77 = arith.select %75, %72, %76 : vector<16x128xi1>, vector<16x128xf32>
    %cst_55 = arith.constant dense<0xFF800000> : vector<16xf32>
    %78 = vector.multi_reduction <maximumf>, %77, %cst_55 [1] : vector<16x128xf32> to vector<16xf32>
    %79 = vector.shape_cast %78 : vector<16xf32> to vector<16x1xf32>
    %80 = vector.broadcast %79 : vector<16x1xf32> to vector<16x128xf32>
    %81 = arith.subf %77, %80 : vector<16x128xf32>
    %82 = math.exp %81 : vector<16x128xf32>
    %cst_56 = arith.constant dense<0.000000e+00> : vector<16xf32>
    %83 = vector.multi_reduction <add>, %82, %cst_56 [1] : vector<16x128xf32> to vector<16xf32>
    %84 = vector.shape_cast %83 : vector<16xf32> to vector<16x1xf32>
    %85 = math.log %84 : vector<16x1xf32>
    %86 = vector.broadcast %85 : vector<16x1xf32> to vector<16x128xf32>
    %87 = arith.subf %81, %86 : vector<16x128xf32>
    %c0_57 = arith.constant 0 : index
    %c0_58 = arith.constant 0 : index
    %88 = vector.load %arg6[%c0_57, %c0_58] : memref<16x128xf32, #tpu.memory_space<vmem>>, vector<16x128xf32>
    tpu.vector_store %arg6[%c0_57, %c0_58], %87 {strides = array<i32>} : memref<16x128xf32, #tpu.memory_space<vmem>>, vector<16x128xf32>,
    return
  }
}

</mosaic_0001>

<bundles_post_ra>
// kernel: tpu_custom_call.1
= control target key start
LH: loop header
LB: loop body
LE: loop exit
PB: predicated region body
PF: predicated region fallthrough
CT: control target
= control target key end

     0   :  { %11 = vsyncpa [#allocation3], 0  ;;  %s1048_s0 = inlined_call_operand.hbm [shape: f32[16,128], index: 0, kind: input, shape index: {}]   ;;  %s1049_s1 = inlined_call_operand.hbm [shape: f32[1,128], index: 1, kind: input, shape index: {}]   ;;  %s1050_s2 = inlined_call_operand.hbm [shape: f32[16,16], index: 2, kind: input, shape index: {}]   ;;  %s1051_s3 = inlined_call_operand.hbm [shape: bf16[4,128,128], index: 3, kind: input, shape index: {}]   ;;  %s1052_s4 = inlined_call_operand.hbm [shape: f32[4,1,128], index: 4, kind: input, shape index: {}]   ;;  %s1053_s5 = inlined_call_operand.vmem [shape: f32[4,1,128], index: 5, kind: input, shape index: {}]   ;;  %s1054_s6 = inlined_call_operand.hbm [shape: f32[16,128], index: 6, kind: output, shape index: {}]  }
   0x1   :  { %12 = vsyncpa [#allocation6], 0 }
   0x2   :  { %13 = vsyncpa [#allocation9], 0  ;;  %s33_s23 = sshll.u32 %s1049_s1, 4  ;;  %s34_s23 = int_to_ptr.hbm [resolvable:$true] %s33_s23 }
   0x3   :  { %14 = vsyncpa [#allocation4], 0  ;;  %s949_s24 = smov [#allocation5]   ;;  %s56_s28 = sshll.u32 %s1051_s3, 4  ;;  %s57_s28 = int_to_ptr.hbm [resolvable:$true] %s56_s28 }
   0x4   :  { %s35_s25 = sshll.u32 %s949_s24, 4  ;;  %s950_s29 = smov [#allocation8]   ;;  %s36_s25 = int_to_ptr.vmem [resolvable:$true] %s35_s25 }
   0x5   :  { %38 = dma.hbm_to_vmem [thread:$0]  %s34_s23, 16, %s36_s25, [#allocation6]  }
   0x6   :  { %s58_s30 = sshll.u32 %s950_s29, 4  ;;  %s951_s7 = smov 64   ;;  %s59_s30 = int_to_ptr.vmem [resolvable:$true] %s58_s30 }
   0x7   :  { %s952_s8 = smov 4   ;;  %s19_s1 = sshll.u32 %s1048_s0, 4  ;;  %s20_s1 = int_to_ptr.hbm [resolvable:$true] %s19_s1 }
   0x8   :  { %64 = dma.hbm_to_vmem [thread:$0]  %s57_s28, 4096, %s59_s30, [#allocation9], %s951_s7, %s951_s7, %s952_s8  }
   0x9   :  { %s953_s11 = smov [#allocation2]   ;;  %s43_s3 = sshll.u32 %s1050_s2, 4  ;;  %s44_s3 = int_to_ptr.hbm [resolvable:$true] %s43_s3 }
   0xa   :  { %s21_s12 = sshll.u32 %s953_s11, 4  ;;  %s954_s15 = smov 128   ;;  %s22_s12 = int_to_ptr.vmem [resolvable:$true] %s21_s12 }
   0xb   :  { %s955_s16 = smov 8   ;;  %s956_s17 = smov [#allocation7]  }
   0xc   :  { %27 = dma.hbm_to_vmem [thread:$0]  %s20_s1, 256, %s22_s12, [#allocation3], %s954_s15, %s954_s15, %s955_s16  }
   0xd   :  { %s45_s18 = sshll.u32 %s956_s17, 4  ;;  %s69_s0 = sshll.u32 %s1052_s4, 4  ;;  %s46_s18 = int_to_ptr.vmem [resolvable:$true] %s45_s18  ;;  %s70_s0 = int_to_ptr.hbm [resolvable:$true] %s69_s0 }
   0xe   :  { %51 = dma.hbm_to_vmem [thread:$0]  %s44_s3, 256, %s46_s18, [#allocation6], %s954_s15, %s954_s15, %s955_s16  }
   0xf   :  { %s957_s2 = smov [#allocation10]   ;;  %s958_s22 = smov 16  }
  0x10   :  { %s71_s21 = sshll.u32 %s957_s2, 4  ;;  %s959_s23 = smov 1   ;;  %s72_s21 = int_to_ptr.vmem [resolvable:$true] %s71_s21 }
  0x11   :  { %77 = dma.hbm_to_vmem [thread:$0]  %s70_s0, 64, %s72_s21, [#allocation9], %s958_s22, %s958_s22, %s959_s23  }
  0x12   :  { %941 = dma.done.wait [#allocation3], 256  }
  0x13   :  { %942 = vsyncadd [#allocation3], 4294967040 }
  0x14   :  { %943 = dma.done.wait [#allocation6], 272  }
  0x15   :  { %944 = vsyncadd [#allocation6], 4294967024 }
  0x16   :  { %945 = dma.done.wait [#allocation9], 4160  }
  0x17   :  { %946 = vsyncadd [#allocation9], 4294963136  ;;  %v740_v0 = vld [vmem:[#allocation8 + $0x38] sm:$0xff]  ;;  %v739_v1 = vld [vmem:[#allocation8 + $0x30] sm:$0xff]  ;;  %v960_v15 = vmov -1.0   ;;  %vm389_vm6 = vcmask 130048  }
  0x18   :  { %179 = vmatpush.bf16.msra.mxu0 %v740_v0  ;;  %v748_v2 = vld [vmem:[#allocation8 + $0x78] sm:$0xff]  ;;  %v738_v3 = vld [vmem:[#allocation8 + $0x28] sm:$0xff]  ;;  %v747_v4 = vld [vmem:[#allocation8 + $0x70] sm:$0xff]  ;;  %s583_s10 = sshll.u32 %s1054_s6, 4  ;;  %s584_s10 = int_to_ptr.hbm [resolvable:$true] %s583_s10 }
  0x19   :  { %277 = vmatpush.bf16.msra.mxu1 %v748_v2  ;;  %v737_v5 = vld [vmem:[#allocation8 + $0x20] sm:$0xff]  ;;  %v746_v6 = vld [vmem:[#allocation8 + $0x68] sm:$0xff]  ;;  %v736_v7 = vld [vmem:[#allocation8 + $0x18] sm:$0xff] }
  0x1a   :  { %v745_v8 = vld [vmem:[#allocation8 + $0x60] sm:$0xff]  ;;  %v735_v9 = vld [vmem:[#allocation8 + $0x10] sm:$0xff]  ;;  %v780_v10 = vld [vmem:[#allocation5] ss:$0 sm:$0xff] }
  0x1b   :  { %v100_v11 = vld [vmem:[#allocation2] sm:$0xff]  ;;  %v101_v12 = vld [vmem:[#allocation2 + $0x8] sm:$0xff]  ;;  %v743_v20 = vld [vmem:[#allocation8 + $0x50] sm:$0xff] }
  0x1c   :  { %180 = vmatpush.bf16.msra.mxu0 %v739_v1  ;;  %v734_v13 = vld [vmem:[#allocation8 + $0x8] sm:$0xff]  ;;  %vm126_vm0 = vcmp.ge.f32.partialorder %v100_v11, %v780_v10  ;;  %vm127_vm1 = vcmp.ge.f32.partialorder %v101_v12, %v780_v10  ;;  %v733_v14 = vld [vmem:[#allocation8] sm:$0xff]  ;;  %v744_v19 = vld [vmem:[#allocation8 + $0x58] sm:$0xff] }
  0x1d   :  { %278 = vmatpush.bf16.msra.mxu1 %v747_v4  ;;  %v128_v16 = vsel %vm126_vm0, 1.0, %v960_v15  ;;  %v129_v17 = vsel %vm127_vm1, 1.0, %v960_v15  ;;  %v742_v21 = vld [vmem:[#allocation8 + $0x48] sm:$0xff]  ;;  %v741_v22 = vld [vmem:[#allocation8 + $0x40] sm:$0xff]  ;;  %v756_v23 = vld [vmem:[#allocation8 + $0xb8] sm:$0xff] }
  0x1e   :  { %v130_v18 = vpack.c.bf16 %v129_v17, %v128_v16  ;;  %375 = vmatpush.bf16.msra.mxu2 %v756_v23  ;;  %v755_v24 = vld [vmem:[#allocation8 + $0xb0] sm:$0xff]  ;;  %v754_v25 = vld [vmem:[#allocation8 + $0xa8] sm:$0xff]  ;;  %v753_v26 = vld [vmem:[#allocation8 + $0xa0] sm:$0xff] }
  0x1f   :  { %v781_v27 = vld [vmem:[#allocation10] ss:$0 sm:$0xff]  ;;  %v782_v30 = vld [vmem:[%s1053_s5] ss:$0 sm:$0xff]  ;;  %v751_v39 = vld [vmem:[#allocation8 + $0x90] sm:$0xff] }
  0x20   :  { %181 = vmatpush.bf16.msra.mxu0 %v738_v3  ;;  %v752_v38 = vld [vmem:[#allocation8 + $0x98] sm:$0xff]  ;;  %v750_v40 = vld [vmem:[#allocation8 + $0x88] sm:$0xff]  ;;  %v749_v41 = vld [vmem:[#allocation8 + $0x80] sm:$0xff] }
  0x21   :  { %279 = vmatpush.bf16.msra.mxu1 %v746_v6  ;;  %v783_v42 = vld [vmem:[#allocation10 + $0x1] ss:$0 sm:$0xff]  ;;  %v784_v45 = vld [vmem:[%s1053_s5 + $0x1] ss:$0 sm:$0xff]  ;;  %v103_v55 = vld [vmem:[#allocation7] sm:$0xff] }
  0x22   :  { %376 = vmatpush.bf16.msra.mxu2 %v755_v24  ;;  %v764_v56 = vld [vmem:[#allocation8 + $0xf8] sm:$0xff]  ;;  %v763_v57 = vld [vmem:[#allocation8 + $0xf0] sm:$0xff]  ;;  %v762_v59 = vld [vmem:[#allocation8 + $0xe8] sm:$0xff] }
  0x23   :  { %v104_v58 = vld [vmem:[#allocation7 + $0x8] sm:$0xff]  ;;  %v761_v60 = vld [vmem:[#allocation8 + $0xe0] sm:$0xff]  ;;  %v759_v62 = vld [vmem:[#allocation8 + $0xd0] sm:$0xff] }
  0x24   :  { %182 = vmatpush.bf16.msra.mxu0 %v737_v5  ;;  %v760_v61 = vld [vmem:[#allocation8 + $0xd8] sm:$0xff]  ;;  %v758_v63 = vld [vmem:[#allocation8 + $0xc8] sm:$0xff]  ;;  %v757_v0 = vld [vmem:[#allocation8 + $0xc0] sm:$0xff] }
  0x25   :  { %280 = vmatpush.bf16.msra.mxu1 %v745_v8  ;;  %v785_v1 = vld [vmem:[#allocation10 + $0x2] ss:$0 sm:$0xff]  ;;  %v786_v4 = vld [vmem:[%s1053_s5 + $0x2] ss:$0 sm:$0xff]  ;;  %v787_v16 = vld [vmem:[#allocation10 + $0x3] ss:$0 sm:$0xff] }
  0x26   :  { %377 = vmatpush.bf16.msra.mxu2 %v754_v25 }
  0x28   :  { %183 = vmatpush.bf16.msra.mxu0 %v736_v7 }
  0x29   :  { %281 = vmatpush.bf16.msra.mxu1 %v744_v19 }
  0x2a   :  { %378 = vmatpush.bf16.msra.mxu2 %v753_v26 }
  0x2c   :  { %184 = vmatpush.bf16.msra.mxu0 %v735_v9 }
  0x2d   :  { %282 = vmatpush.bf16.msra.mxu1 %v743_v20 }
  0x2e   :  { %379 = vmatpush.bf16.msra.mxu2 %v752_v38 }
  0x30   :  { %185 = vmatpush.bf16.msra.mxu0 %v734_v13 }
  0x31   :  { %283 = vmatpush.bf16.msra.mxu1 %v742_v21 }
  0x32   :  { %380 = vmatpush.bf16.msra.mxu2 %v751_v39 }
  0x34   :  { %186 = vmatpush.bf16.msra.mxu0 %v733_v14  ;;  %v550_v14 = vlaneseq }
  0x35   :  { %284 = vmatpush.bf16.msra.mxu1 %v741_v22 }
  0x36   :  { %381 = vmatpush.bf16.msra.mxu2 %v750_v40  ;;  %v551_v17 = vand.u32 127, %v550_v14 }
  0x37   :  { %187 = vmatmul.bf16.vlgmr.msra.gmra.mxu0 %v130_v18  ;;  %v788_v18 = vld [vmem:[%s1053_s5 + $0x3] ss:$0 sm:$0xff]  ;;  %s961_s5 = smov [#allocation11]  }
  0x38   :  { %vm552_vm9 = vcmp.lt.s32.totalorder %v551_v17, 7  ;;  %s581_s7 = sshll.u32 %s961_s5, 4  ;;  %s582_s7 = int_to_ptr.vmem [resolvable:$true] %s581_s7 }
  0x3a   :  { %382 = vmatpush.bf16.msra.mxu2 %v749_v41 }
  0xb4   :  { %v188_v28 = vpop.f32.mrf.mxu0 }
  0xb5   :  { %v196_v29 = vmul.f32 %v781_v27, %v188_v28 }
  0xb7   :  { %v201_v31 = vadd.f32 %v782_v30, %v196_v29 }
  0xb9   :  { %vm224_vm2 = vcmp.ge.f32.partialorder %v201_v31, 0.0 }
  0xba   :  { %v226_v35 = vsel %vm224_vm2, 1.0, %v960_v15 }
  0xbc   :  { %v190_v32 = vpop.f32.mrf.mxu0 }
  0xbd   :  { %v197_v33 = vmul.f32 %v781_v27, %v190_v32 }
  0xbf   :  { %v202_v34 = vadd.f32 %v782_v30, %v197_v33 }
  0xc1   :  { %vm225_vm3 = vcmp.ge.f32.partialorder %v202_v34, 0.0 }
  0xc2   :  { %v227_v36 = vsel %vm225_vm3, 1.0, %v960_v15 }
  0xc3   :  { %v228_v37 = vpack.c.bf16 %v227_v36, %v226_v35 }
  0xc5   :  { %285 = vmatmul.bf16.vlgmr.msra.gmra.mxu1 %v228_v37 }
 0x142   :  { %v286_v43 = vpop.f32.mrf.mxu1 }
 0x143   :  { %v294_v44 = vmul.f32 %v783_v42, %v286_v43 }
 0x145   :  { %v299_v46 = vadd.f32 %v784_v45, %v294_v44 }
 0x147   :  { %vm322_vm4 = vcmp.ge.f32.partialorder %v299_v46, 0.0 }
 0x148   :  { %v324_v50 = vsel %vm322_vm4, 1.0, %v960_v15 }
 0x14a   :  { %v288_v47 = vpop.f32.mrf.mxu1 }
 0x14b   :  { %v295_v48 = vmul.f32 %v783_v42, %v288_v47 }
 0x14d   :  { %v300_v49 = vadd.f32 %v784_v45, %v295_v48 }
 0x14f   :  { %vm323_vm5 = vcmp.ge.f32.partialorder %v300_v49, 0.0 }
 0x150   :  { %v325_v51 = vsel %vm323_vm5, 1.0, %v960_v15 }
 0x151   :  { %v326_v52 = vpack.c.bf16 %v325_v51, %v324_v50 }
 0x153   :  { %383 = vmatmul.bf16.vlgmr.msra.gmra.mxu2 %v326_v52 }
 0x1d6   :  { %v384_v53 = vpop.f32.mrf.mxu2 }
 0x1de   :  { %v386_v54 = vpop.f32.mrf.mxu2 }
 0x1df   :  { %410 = vmatpush.msra.mxu3 %v386_v54 }
 0x1e1   :  { %411 = vmatpush.msra.mxu3 %v384_v53 }
 0x1e2   :  { %696 = vmatmul.msk.f32.vlgmr.msra.gmra.mxu3 %vm389_vm6, %v103_v55 }
 0x1e3   :  { %503 = vmatpush.bf16.msrb.mxu3 %v764_v56 }
 0x1e7   :  { %504 = vmatpush.bf16.msrb.mxu3 %v763_v57 }
 0x1ea   :  { %697 = vmatmul.msk.f32.gmra.mxu3 %vm389_vm6, %v104_v58 }
 0x1eb   :  { %505 = vmatpush.bf16.msrb.mxu3 %v762_v59 }
 0x1ef   :  { %506 = vmatpush.bf16.msrb.mxu3 %v761_v60 }
 0x1f3   :  { %507 = vmatpush.bf16.msrb.mxu3 %v760_v61 }
 0x1f7   :  { %508 = vmatpush.bf16.msrb.mxu3 %v759_v62 }
 0x1fb   :  { %509 = vmatpush.bf16.msrb.mxu3 %v758_v63 }
 0x1ff   :  { %510 = vmatpush.bf16.msrb.mxu3 %v757_v0 }
 0x265   :  { %v413_v2 = vpop.f32.mrf.mxu3 }
 0x266   :  { %v422_v3 = vmul.f32 %v785_v1, %v413_v2 }
 0x268   :  { %v427_v5 = vadd.f32 %v786_v4, %v422_v3 }
 0x26a   :  { %vm450_vm7 = vcmp.ge.f32.partialorder %v427_v5, 0.0 }
 0x26b   :  { %v452_v9 = vsel %vm450_vm7, 1.0, %v960_v15 }
 0x26d   :  { %v416_v6 = vpop.f32.mrf.mxu3 }
 0x26e   :  { %v423_v7 = vmul.f32 %v785_v1, %v416_v6 }
 0x270   :  { %v428_v8 = vadd.f32 %v786_v4, %v423_v7 }
 0x272   :  { %vm451_vm8 = vcmp.ge.f32.partialorder %v428_v8, 0.0 }
 0x273   :  { %v453_v10 = vsel %vm451_vm8, 1.0, %v960_v15 }
 0x274   :  { %v454_v11 = vpack.c.bf16 %v453_v10, %v452_v9 }
 0x276   :  { %511 = vmatmul.bf16.vlgmr.msrb.gmra.mxu3 %v454_v11 }
 0x2f9   :  { %v512_v12 = vpop.f32.mrf.mxu3 }
 0x301   :  { %v514_v13 = vpop.f32.mrf.mxu3 }
 0x302   :  { %531 = vmatpush.msrb.mxu0 %v514_v13  ;;  %765 = vmatpush.msrb.mxu1 %v514_v13 }
 0x304   :  { %532 = vmatpush.msrb.mxu0 %v512_v12  ;;  %766 = vmatpush.msrb.mxu1 %v512_v12 }
 0x305   :  { %731 = vmatmul.msk.f32.vlgmr.msrb.gmra.mxu0 %vm389_vm6, %v103_v55  ;;  %732 = vmatmul.msk.f32.vlgmr.msrb.gmra.mxu1 %vm389_vm6, %v104_v58 }
 0x382   :  { %v534_v15 = vpop.f32.mrf.mxu0  ;;  %v537_v19 = vpop.f32.mrf.mxu1 }
 0x383   :  { %v543_v20 = vmul.f32 %v787_v16, %v534_v15  ;;  %v544_v22 = vmul.f32 %v787_v16, %v537_v19 }
 0x385   :  { %v548_v21 = vadd.f32 %v788_v18, %v543_v20  ;;  %v549_v24 = vadd.f32 %v788_v18, %v544_v22 }
 0x387   :  { %v553_v23 = vsel %vm552_vm9, %v548_v21, -1e+30  ;;  %v554_v25 = vsel %vm552_vm9, %v549_v24, -1e+30 }
 0x388   :  { %555 = vmax.xlane.f32.xlu0 %v553_v23 }
 0x390   :  { %557 = vmax.xlane.f32.xlu0 %v554_v25 }
 0x3fb   :  { %v556_v26 = vpop.xlane.xlu0 %555 }
 0x3fc   :  { %v559_v27 = vsub.f32 %v553_v23, %v556_v26 }
 0x3fe   :  { %v561_v28 = vmul.f32 1.442695, %v559_v27 }
 0x400   :  { %789 = vpow2.f32 %v561_v28 }
 0x403   :  { %v558_v29 = vpop.xlane.xlu0 %557 }
 0x404   :  { %v560_v30 = vsub.f32 %v554_v25, %v558_v29 }
 0x406   :  { %v790_v31 = vpop.eup %789  ;;  %v563_v32 = vmul.f32 1.442695, %v560_v30 }
 0x407   :  { %565 = vadd.xlane.f32.xlu1 %v790_v31 }
 0x408   :  { %791 = vpow2.f32 %v563_v32 }
 0x40e   :  { %v792_v33 = vpop.eup %791 }
 0x40f   :  { %567 = vadd.xlane.f32.xlu1 %v792_v33 }
 0x47a   :  { %v566_v34 = vpop.xlane.xlu1 %565 }
 0x47b   :  { %793 = vlog2.f32 %v566_v34 }
 0x481   :  { %v794_v35 = vpop.eup %793 }
 0x482   :  { %v570_v36 = vmul.f32 0.6931472, %v794_v35  ;;  %v568_v37 = vpop.xlane.xlu1 %567 }
 0x483   :  { %795 = vlog2.f32 %v568_v37 }
 0x484   :  { %v573_v38 = vsub.f32 %v559_v27, %v570_v36 }
 0x486   :  { %575 = vst [vmem:[#allocation11] sm:$0xff] %v573_v38 }
 0x489   :  { %v796_v39 = vpop.eup %795 }
 0x48a   :  { %v572_v40 = vmul.f32 0.6931472, %v796_v39 }
 0x48c   :  { %v574_v41 = vsub.f32 %v560_v30, %v572_v40 }
 0x48e   :  { %576 = vst [vmem:[#allocation11 + $0x8] sm:$0xff] %v574_v41 }
 0x48f   :  { %589 = dma.vmem_to_hbm [thread:$0]  %s582_s7, 256, %s584_s10, [#allocation4], %s954_s15, %s954_s15, %s955_s16  }
 0x490   :  { %947 = dma.done.wait [#allocation4], 256  }
 0x491   :  { %948 = vsyncadd [#allocation4], 4294967040 }
 0x492   :  { %594 = vsyncpa [#allocation3], 1 }
 0x493   :  { %595 = vsyncpa [#allocation6], 1 }
 0x494   :  { %596 = vsyncpa [#allocation9], 1 }
 0x495   :  { %597 = vsyncpa [#allocation4], 1 }

</bundles_post_ra>
